<compile_context>
chip_gen: v5e
topology: v5e:2x2
jax: 0.10.0
libtpu: 0.0.40
codegen_flags: <defaults>
</compile_context>

<pallas_src>
import math

import jax
import jax.numpy as jnp
import numpy as np
from jax import lax
from jax.experimental import pallas as pl
from jax.experimental.pallas import tpu as pltpu

_NEG_LARGE = -1.0e30   # finite "minus infinity" for masked similarity columns
_BIG_DIST = 3.0e38     # finite "plus infinity" for padded distance entries


def _round_up(x, m):
    return (x + m - 1) // m * m


def _vmem_capacity_bytes():
    """Physical VMEM per core; conservative fallback if the query is unavailable."""
    try:
        info = pltpu.get_tpu_info()
        for name in ("vmem_capacity_bytes", "vmem_size_bytes", "vmem_bytes"):
            v = getattr(info, name, None)
            if v:
                return int(v)
    except Exception:
        pass
    return 64 * 1024 * 1024   # assume v7x-sized VMEM when unknown


def make_correspondence_loss_kernel(tile_n1, n2, n2p, dist_th):
    dist_th = float(dist_th)
    pad_cols = (n2 != n2p)   # static: skip column-bias work when N2 % 128 == 0

    def kernel(d1_ref, d2_ref, dist_ref, out_ref,
               colzero_ref, colbias_ref, rowcache_ref):
        p = pl.program_id(0)            # 0: dist pass, 1: similarity pass
        t = pl.program_id(1)
        last_t = pl.num_programs(1) - 1

        @pl.when(jnp.logical_and(p == 0, t == 0))
        def _init():
            colzero_ref[...] = jnp.zeros_like(colzero_ref)
            out_ref[...] = jnp.zeros_like(out_ref)
            if pad_cols:
                cj = lax.broadcasted_iota(jnp.int32, (1, n2p), 1)
                colbias_ref[...] = jnp.where(cj < n2, 0.0, _NEG_LARGE)

        # ---- pass 0: min/argmin/mask per row; cache them; build target-col mask
        @pl.when(p == 0)
        def _pass0():
            dm = dist_ref[...]                                            # (T,N2p)
            col_ids = lax.broadcasted_iota(jnp.int32, (tile_n1, n2p), 1)
            min_dist = jnp.min(dm, axis=1, keepdims=True)                 # (T,1)
            ndx = jnp.min(jnp.where(dm == min_dist, col_ids, n2p),
                          axis=1, keepdims=True)                          # (T,1) int
            maskb = min_dist <= dist_th                                   # (T,1)
            maskf = maskb.astype(jnp.float32)

            hit = jnp.where(jnp.logical_and(col_ids == ndx, maskb), 1.0, 0.0)
            colzero_ref[...] = jnp.maximum(
                colzero_ref[...], jnp.max(hit, axis=0, keepdims=True))

            lane2 = lax.broadcasted_iota(jnp.int32, (tile_n1, 2), 1)
            rowcache_ref[t] = jnp.where(lane2 == 0, ndx.astype(jnp.float32), maskf)

        # ---- pass 1: similarity, CE, metrics; dist never touched --------------
        @pl.when(p == 1)
        def _pass1():
            cached = rowcache_ref[t]                                      # (T,2)
            ndx = cached[:, 0:1].astype(jnp.int32)                        # (T,1)
            maskf = cached[:, 1:2]                                        # (T,1)

            # desc1 tile is pre-scaled by exp(beta) in the wrapper; bf16 MXU
            # matmul with f32 accumulation, contracting last dims (no transpose).
            sim = lax.dot_general(d1_ref[...], d2_ref[...],
                                  (((1,), (1,)), ((), ())),
                                  preferred_element_type=jnp.float32)     # (T,N2p)
            if pad_cols:
                sim = sim + colbias_ref[...]          # additive pad-column bias

            col_ids = lax.broadcasted_iota(jnp.int32, (tile_n1, n2p), 1)
            row_max = jnp.max(sim, axis=1, keepdims=True)
            lse = row_max + jnp.log(jnp.sum(jnp.exp(sim - row_max),
                                            axis=1, keepdims=True))
            is_tgt = col_ids == ndx
            tgt_logit = jnp.max(jnp.where(is_tgt, sim, _NEG_LARGE),
                                axis=1, keepdims=True)
            ce = lse - tgt_logit

            amax = jnp.min(jnp.where(sim == row_max, col_ids, n2p),
                           axis=1, keepdims=True)
            tp = (amax == ndx).astype(jnp.float32)

            neg_max = jnp.max(jnp.where(colzero_ref[...] > 0.0, 0.0, sim),
                              axis=1, keepdims=True)

            # Lane-pack the five per-row quantities -> one sublane reduce, one
            # resident (1,8) accumulator (the output block itself).  The per-tile
            # partial sum + running f32 accumulator is a two-level accumulation.
            lane8 = lax.broadcasted_iota(jnp.int32, (tile_n1, 8), 1)
            packed = (jnp.where(lane8 == 0, ce, 0.0)
                      + jnp.where(lane8 == 1, 1.0, 0.0)
                      + jnp.where(lane8 == 2, tp, 0.0)
                      + jnp.where(lane8 == 3, amax.astype(jnp.float32), 0.0)
                      + jnp.where(lane8 == 4, neg_max, 0.0)) * maskf      # (T,8)
            out_ref[...] += jnp.sum(packed, axis=0, keepdims=True)        # (1,8)

        @pl.when(jnp.logical_and(p == 1, t == last_t))
        def _finalize():
            acc = out_ref[...]                                            # (1,8)
            lane = lax.broadcasted_iota(jnp.int32, (1, 8), 1)
            num = jnp.max(jnp.where(lane == 1, acc, 0.0),
                          axis=1, keepdims=True)                          # (1,1)
            inv = 1.0 / num                    # inf when num == 0
            div_lane = jnp.logical_or(lane == 0,
                                      jnp.logical_or(lane == 3, lane == 4))
            res = jnp.where(div_lane, acc * inv, acc)
            # num == 0: loss stays NaN (0*inf, matches torch CE on empty batch);
            # pos/neg similarity forced to 0 like the torch else-branch.
            zero_lane = jnp.logical_or(lane == 3, lane == 4)
            res = jnp.where(jnp.logical_and(num <= 0.0, zero_lane), 0.0, res)
            out_ref[...] = res

    return kernel


def correspondence_loss(desc1, desc2, dist_kp1_trans_kp2, beta, dist_th=0.5,
                        max_tile_n1=1024, desc_dtype=jnp.bfloat16):
    N1, D = desc1.shape
    N2, D2 = desc2.shape
    assert D2 == D
    assert dist_kp1_trans_kp2.shape == (N1, N2)

    n2p = _round_up(N2, 128)
    dp = _round_up(D, 128)
    desc_bytes = jnp.dtype(desc_dtype).itemsize

    # ---- generation-aware VMEM budget: 128 MiB chips (v5e/v6e) vs 64 MiB (v7x) --
    cap = _vmem_capacity_bytes()
    if cap >= 100 * 1024 * 1024:
        vmem_limit = 100 * 1024 * 1024
    else:
        vmem_limit = 48 * 1024 * 1024
    budget = int(vmem_limit * 0.8)

    max_tile_n1 = max(16, min(int(max_tile_n1), 1024))
    # Resident footprint: desc2 (double-buffered) + colzero + colbias + rowcache
    # (lane-padded to 128) + slack; per-row: dist tile (x2 bufs), d1 tile (x2),
    # ~6 (T, N2p) f32 in-kernel temporaries (sim / exp / iota / compares / selects).
    fixed = (2 * n2p * dp * desc_bytes + 2 * 8 * n2p * 4
             + _round_up(N1 + max_tile_n1, 8) * 128 * 4 + (1 << 20))
    per_row = 2 * n2p * 4 + 2 * dp * desc_bytes + 6 * n2p * 4
    rows = max(16, (budget - fixed) // per_row)
    tile_n1 = min(_round_up(N1, 16), _round_up(max_tile_n1, 16),
                  max(16, (rows // 16) * 16))
    n1p = _round_up(N1, tile_n1)
    n_tiles = n1p // tile_n1

    f32 = jnp.float32
    scale = float(math.exp(float(beta)))
    # exp(beta) folded into desc1 here: it fuses with the cast/pad ops the wrapper
    # performs anyway and removes all in-kernel scaling work (cheaper than scaling
    # even the (T, D) tile inside the kernel).
    d1p = jnp.zeros((n1p, dp), desc_dtype).at[:N1, :D].set(
        (desc1.astype(f32) * scale).astype(desc_dtype))
    d2p = jnp.zeros((n2p, dp), desc_dtype).at[:N2, :D].set(
        desc2.astype(desc_dtype))
    dmp = jnp.full((n1p, n2p), _BIG_DIST, f32).at[:N1, :N2].set(
        dist_kp1_trans_kp2.astype(f32))

    kernel = make_correspondence_loss_kernel(tile_n1, N2, n2p, dist_th)

    out = pl.pallas_call(
        kernel,
        out_shape=jax.ShapeDtypeStruct((1, 8), jnp.float32),
        grid=(2, n_tiles),
        in_specs=[
            # desc1: parked at block 0 in pass 0, streamed over N1 in pass 1
            pl.BlockSpec((tile_n1, dp), lambda p, t: (p * t, 0)),
            # desc2: constant index map -> fetched once, resident for whole grid
            pl.BlockSpec((n2p, dp), lambda p, t: (0, 0)),
            # dist: streamed over N1 in pass 0 only; frozen at block 0 in pass 1
            # so no pass-1 DMAs are issued for the dominant HBM input
            pl.BlockSpec((tile_n1, n2p), lambda p, t: ((1 - p) * t, 0)),
        ],
        out_specs=pl.BlockSpec((1, 8), lambda p, t: (0, 0)),
        scratch_shapes=[
            pltpu.VMEM((1, n2p), jnp.float32),               # target-column zero mask
            pltpu.VMEM((1, n2p), jnp.float32),               # additive pad-column bias
            pltpu.VMEM((n_tiles, tile_n1, 2), jnp.float32),  # (argmin, mask) row cache
        ],
        compiler_params=pltpu.CompilerParams(
            dimension_semantics=("arbitrary", "arbitrary"),
            vmem_limit_bytes=int(vmem_limit)),
    )(d1p, d2p, dmp)

    loss = out[0, 0]
    metrics = {
        'correspondence_loss': loss,
        'matching_keypoints': out[0, 1],
        'matching_descriptors': out[0, 2],
        'pos_similarity': out[0, 3],
        'neg_similarity': out[0, 4],
    }
    return loss, metrics


def _ref_numpy(d1_eff, d2_eff, dist, dist_th):
    """Reference on the effective (quantized, pre-scaled) descriptors."""
    d1 = np.asarray(d1_eff, np.float64)
    d2 = np.asarray(d2_eff, np.float64)
    dm = np.asarray(dist, np.float64)
    min_dist = dm.min(axis=1)
    ndx = dm.argmin(axis=1)
    mask = min_dist <= dist_th
    sim = d1[mask] @ d2.T
    tgt = ndx[mask]
    m = sim.max(axis=1, keepdims=True)
    lse = m[:, 0] + np.log(np.exp(sim - m).sum(axis=1))
    ce = lse - sim[np.arange(sim.shape[0]), tgt]
    loss = ce.mean()
    mk = float(mask.sum())
    amax = sim.argmax(axis=1)
    md = float((amax == tgt).sum())
    pos = float(amax.astype(np.float64).mean())
    neg_mat = sim.copy()
    neg_mat[:, tgt] = 0.0
    neg = float(neg_mat.max(axis=1).mean())
    return loss, mk, md, pos, neg


if __name__ == "__main__":
    beta, dist_th = 0.5, 0.5
    scale = math.exp(beta)
    key = jax.random.PRNGKey(0)

    tests = [
        # small, single-tile case (module's nominal sizes), bf16 matmul path
        dict(N1=16, N2=24, D=32, minv=0.4, maxv=2.4, tile=256, dt=jnp.bfloat16),
        # multi-tile case with row/column/feature padding, bf16 matmul path
        dict(N1=72, N2=150, D=96, minv=0.45, maxv=8.0, tile=32, dt=jnp.bfloat16),
        # N2 multiple of 128 (static no-column-bias branch), f32 matmul path
        dict(N1=40, N2=128, D=64, minv=0.3, maxv=4.0, tile=16, dt=jnp.float32),
    ]

    for cfg in tests:
        key, k1, k2, k3 = jax.random.split(key, 4)
        desc1 = jax.random.normal(k1, (cfg['N1'], cfg['D']), dtype=jnp.float32)
        desc2 = jax.random.normal(k2, (cfg['N2'], cfg['D']), dtype=jnp.float32)
        dist = jax.random.uniform(k3, (cfg['N1'], cfg['N2']), dtype=jnp.float32,
                                  minval=cfg['minv'], maxval=cfg['maxv'])

        loss, metrics = correspondence_loss(desc1, desc2, dist, beta, dist_th,
                                            max_tile_n1=cfg['tile'],
                                            desc_dtype=cfg['dt'])
        loss = jax.block_until_ready(loss)
        metrics = {k: float(jax.block_until_ready(v)) for k, v in metrics.items()}

        # Reference mirrors the kernel's effective inputs (pre-scaled + cast to the
        # matmul dtype), so only accumulation-order differences remain.
        d1_eff = np.asarray(((desc1.astype(jnp.float32) * scale)
                             .astype(cfg['dt'])).astype(jnp.float32))
        d2_eff = np.asarray(desc2.astype(cfg['dt']).astype(jnp.float32))
        ref_loss, ref_mk, ref_md, ref_pos, ref_neg = _ref_numpy(
            d1_eff, d2_eff, dist, dist_th)

        np.testing.assert_allclose(float(loss), ref_loss, rtol=1e-3, atol=1e-3)
        np.testing.assert_allclose(metrics['matching_keypoints'], ref_mk, atol=1e-5)
        np.testing.assert_allclose(metrics['matching_descriptors'], ref_md, atol=1e-5)
        np.testing.assert_allclose(metrics['pos_similarity'], ref_pos,
                                   rtol=1e-3, atol=1e-3)
        np.testing.assert_allclose(metrics['neg_similarity'], ref_neg,
                                   rtol=1e-3, atol=1e-3)

    print("KERNEL_OK")
</pallas_src>

<mosaic_0001>
module attributes {stable_mosaic.version = 11 : i64} {
  func.func @kernel(%arg0: i32, %arg1: i32, %arg2: memref<16x128xbf16, #tpu.memory_space<vmem>>, %arg3: memref<128x128xbf16, #tpu.memory_space<vmem>>, %arg4: memref<16x128xf32, #tpu.memory_space<vmem>>, %arg5: memref<1x8xf32, #tpu.memory_space<vmem>>, %arg6: memref<1x128xf32, #tpu.memory_space<vmem>>, %arg7: memref<1x128xf32, #tpu.memory_space<vmem>>, %arg8: memref<1x16x2xf32, #tpu.memory_space<vmem>>) attributes {dimension_semantics = [#tpu.dimension_semantics<arbitrary>, #tpu.dimension_semantics<arbitrary>], iteration_bounds = array<i64: 2, 1>, scalar_prefetch = 0 : i64, scratch_operands = 3 : i64, tpu.core_type = #tpu.core_type<tc>, window_params = [{transform_indices = @transform_0, window_bounds = array<i64: 16, 128>}, {pipeline_mode = #tpu.pipeline_mode<synchronous>, transform_indices = @transform_1, window_bounds = array<i64: 128, 128>}, {transform_indices = @transform_2, window_bounds = array<i64: 16, 128>}, {pipeline_mode = #tpu.pipeline_mode<synchronous>, transform_indices = @transform_3, window_bounds = array<i64: 1, 8>}]} {
    %c0_i32 = arith.constant 0 : i32
    %0 = arith.cmpi eq, %arg0, %c0_i32 : i32
    %c0_i32_0 = arith.constant 0 : i32
    %1 = arith.cmpi eq, %arg1, %c0_i32_0 : i32
    %2 = arith.andi %0, %1 : i1
    %3 = arith.extui %2 : i1 to i32
    %c0_i32_1 = arith.constant 0 : i32
    %4 = arith.cmpi ne, %3, %c0_i32_1 : i32
    scf.if %4 {
      %cst = arith.constant 0.000000e+00 : f32
      %16 = vector.broadcast %cst : f32 to vector<1x128xf32>
      %c0 = arith.constant 0 : index
      %c0_8 = arith.constant 0 : index
      %17 = vector.load %arg6[%c0, %c0_8] : memref<1x128xf32, #tpu.memory_space<vmem>>, vector<1x128xf32>
      tpu.vector_store %arg6[%c0, %c0_8], %16 {strides = array<i32>} : memref<1x128xf32, #tpu.memory_space<vmem>>, vector<1x128xf32>,
      %cst_9 = arith.constant 0.000000e+00 : f32
      %18 = vector.broadcast %cst_9 : f32 to vector<1x8xf32>
      %c0_10 = arith.constant 0 : index
      %c0_11 = arith.constant 0 : index
      %19 = vector.load %arg5[%c0_10, %c0_11] : memref<1x8xf32, #tpu.memory_space<vmem>>, vector<1x8xf32>
      tpu.vector_store %arg5[%c0_10, %c0_11], %18 {strides = array<i32>} : memref<1x8xf32, #tpu.memory_space<vmem>>, vector<1x8xf32>,
      %20 = tpu.iota {dimensions = array<i32: 1>} : vector<1x128xi32>
      %c24_i32 = arith.constant 24 : i32
      %21 = vector.broadcast %c24_i32 : i32 to vector<1x128xi32>
      %22 = arith.cmpi slt, %20, %21 : vector<1x128xi32>
      %cst_12 = arith.constant 0.000000e+00 : f32
      %cst_13 = arith.constant -1.000000e+30 : f32
      %23 = vector.broadcast %cst_12 : f32 to vector<1x128xf32>
      %24 = vector.broadcast %cst_13 : f32 to vector<1x128xf32>
      %25 = arith.select %22, %23, %24 : vector<1x128xi1>, vector<1x128xf32>
      %c0_14 = arith.constant 0 : index
      %c0_15 = arith.constant 0 : index
      %26 = vector.load %arg7[%c0_14, %c0_15] : memref<1x128xf32, #tpu.memory_space<vmem>>, vector<1x128xf32>
      tpu.vector_store %arg7[%c0_14, %c0_15], %25 {strides = array<i32>} : memref<1x128xf32, #tpu.memory_space<vmem>>, vector<1x128xf32>,
    } else {
    }
    %c0_i32_2 = arith.constant 0 : i32
    %5 = arith.cmpi eq, %arg0, %c0_i32_2 : i32
    %6 = arith.extui %5 : i1 to i32
    %c0_i32_3 = arith.constant 0 : i32
    %7 = arith.cmpi ne, %6, %c0_i32_3 : i32
    scf.if %7 {
      %c0 = arith.constant 0 : index
      %c0_8 = arith.constant 0 : index
      %16 = vector.load %arg4[%c0, %c0_8] : memref<16x128xf32, #tpu.memory_space<vmem>>, vector<16x128xf32>
      %17 = tpu.iota {dimensions = array<i32: 1>} : vector<16x128xi32>
      %cst = arith.constant dense<0x7F800000> : vector<16xf32>
      %18 = vector.multi_reduction <minimumf>, %16, %cst [1] : vector<16x128xf32> to vector<16xf32>
      %19 = vector.shape_cast %18 : vector<16xf32> to vector<16x1xf32>
      %20 = vector.broadcast %19 : vector<16x1xf32> to vector<16x128xf32>
      %21 = arith.cmpf oeq, %16, %20 : vector<16x128xf32>
      %c128_i32 = arith.constant 128 : i32
      %22 = vector.broadcast %c128_i32 : i32 to vector<16x128xi32>
      %23 = arith.select %21, %17, %22 : vector<16x128xi1>, vector<16x128xi32>
      %cst_9 = arith.constant dense<2147483647> : vector<16xi32>
      %24 = vector.multi_reduction <minsi>, %23, %cst_9 [1] : vector<16x128xi32> to vector<16xi32>
      %25 = vector.shape_cast %24 : vector<16xi32> to vector<16x1xi32>
      %cst_10 = arith.constant 5.000000e-01 : f32
      %26 = vector.broadcast %cst_10 : f32 to vector<16x1xf32>
      %27 = arith.cmpf ole, %19, %26 : vector<16x1xf32>
      %28 = arith.extui %27 : vector<16x1xi1> to vector<16x1xi32>
      %29 = arith.sitofp %28 : vector<16x1xi32> to vector<16x1xf32>
      %30 = vector.broadcast %25 : vector<16x1xi32> to vector<16x128xi32>
      %31 = arith.cmpi eq, %17, %30 : vector<16x128xi32>
      %32 = vector.broadcast %27 : vector<16x1xi1> to vector<16x128xi1>
      %33 = arith.andi %31, %32 : vector<16x128xi1>
      %cst_11 = arith.constant 1.000000e+00 : f32
      %cst_12 = arith.constant 0.000000e+00 : f32
      %34 = vector.broadcast %cst_11 : f32 to vector<16x128xf32>
      %35 = vector.broadcast %cst_12 : f32 to vector<16x128xf32>
      %36 = arith.select %33, %34, %35 : vector<16x128xi1>, vector<16x128xf32>
      %c0_13 = arith.constant 0 : index
      %c0_14 = arith.constant 0 : index
      %37 = vector.load %arg6[%c0_13, %c0_14] : memref<1x128xf32, #tpu.memory_space<vmem>>, vector<1x128xf32>
      %cst_15 = arith.constant dense<0xFF800000> : vector<128xf32>
      %38 = vector.multi_reduction <maximumf>, %36, %cst_15 [0] : vector<16x128xf32> to vector<128xf32>
      %39 = vector.shape_cast %38 : vector<128xf32> to vector<1x128xf32>
      %40 = arith.maximumf %37, %39 : vector<1x128xf32>
      %c0_16 = arith.constant 0 : index
      %c0_17 = arith.constant 0 : index
      %41 = vector.load %arg6[%c0_16, %c0_17] : memref<1x128xf32, #tpu.memory_space<vmem>>, vector<1x128xf32>
      tpu.vector_store %arg6[%c0_16, %c0_17], %40 {strides = array<i32>} : memref<1x128xf32, #tpu.memory_space<vmem>>, vector<1x128xf32>,
      %42 = tpu.iota {dimensions = array<i32: 1>} : vector<16x2xi32>
      %c0_i32_18 = arith.constant 0 : i32
      %43 = vector.broadcast %c0_i32_18 : i32 to vector<16x2xi32>
      %44 = arith.cmpi eq, %42, %43 : vector<16x2xi32>
      %45 = arith.sitofp %25 : vector<16x1xi32> to vector<16x1xf32>
      %46 = vector.shape_cast %45 : vector<16x1xf32> to vector<16x1xf32>
      %47 = vector.broadcast %46 : vector<16x1xf32> to vector<16x2xf32>
      %48 = vector.shape_cast %29 : vector<16x1xf32> to vector<16x1xf32>
      %49 = vector.broadcast %48 : vector<16x1xf32> to vector<16x2xf32>
      %50 = arith.select %44, %47, %49 : vector<16x2xi1>, vector<16x2xf32>
      %51 = arith.index_cast %arg1 : i32 to index
      %c0_19 = arith.constant 0 : index
      %c0_20 = arith.constant 0 : index
      %52 = vector.load %arg8[%51, %c0_19, %c0_20] : memref<1x16x2xf32, #tpu.memory_space<vmem>>, vector<1x16x2xf32>
      %53 = vector.shape_cast %52 : vector<1x16x2xf32> to vector<16x2xf32>
      %54 = vector.shape_cast %50 : vector<16x2xf32> to vector<1x16x2xf32>
      tpu.vector_store %arg8[%51, %c0_19, %c0_20], %54 {strides = array<i32>} : memref<1x16x2xf32, #tpu.memory_space<vmem>>, vector<1x16x2xf32>,
    } else {
    }
    %c1_i32 = arith.constant 1 : i32
    %8 = arith.cmpi eq, %arg0, %c1_i32 : i32
    %9 = arith.extui %8 : i1 to i32
    %c0_i32_4 = arith.constant 0 : i32
    %10 = arith.cmpi ne, %9, %c0_i32_4 : i32
    scf.if %10 {
      %16 = arith.index_cast %arg1 : i32 to index
      %c0 = arith.constant 0 : index
      %c0_8 = arith.constant 0 : index
      %17 = vector.load %arg8[%16, %c0, %c0_8] : memref<1x16x2xf32, #tpu.memory_space<vmem>>, vector<1x16x2xf32>
      %18 = vector.shape_cast %17 : vector<1x16x2xf32> to vector<16x2xf32>
      %19 = vector.extract_strided_slice %18 {offsets = [0, 0], sizes = [16, 1], strides = [1, 1]} : vector<16x2xf32> to vector<16x1xf32>
      %20 = arith.fptosi %19 : vector<16x1xf32> to vector<16x1xi32>
      %21 = vector.extract_strided_slice %18 {offsets = [0, 1], sizes = [16, 1], strides = [1, 1]} : vector<16x2xf32> to vector<16x1xf32>
      %c0_9 = arith.constant 0 : index
      %c0_10 = arith.constant 0 : index
      %22 = vector.load %arg2[%c0_9, %c0_10] : memref<16x128xbf16, #tpu.memory_space<vmem>>, vector<16x128xbf16>
      %c0_11 = arith.constant 0 : index
      %c0_12 = arith.constant 0 : index
      %23 = vector.load %arg3[%c0_11, %c0_12] : memref<128x128xbf16, #tpu.memory_space<vmem>>, vector<128x128xbf16>
      %cst = arith.constant dense<0.000000e+00> : vector<16x128xf32>
      %24 = tpu.matmul %22, %23, %cst {dimension_numbers = #tpu.dot_dimension_numbers<[1], [1], [0], [0], [0, 0, 1, 0], [], []>} : vector<16x128xbf16>, vector<128x128xbf16>, vector<16x128xf32> -> vector<16x128xf32>
      %c0_13 = arith.constant 0 : index
      %c0_14 = arith.constant 0 : index
      %25 = vector.load %arg7[%c0_13, %c0_14] : memref<1x128xf32, #tpu.memory_space<vmem>>, vector<1x128xf32>
      %26 = vector.broadcast %25 : vector<1x128xf32> to vector<16x128xf32>
      %27 = arith.addf %24, %26 : vector<16x128xf32>
      %28 = tpu.iota {dimensions = array<i32: 1>} : vector<16x128xi32>
      %cst_15 = arith.constant dense<0xFF800000> : vector<16xf32>
      %29 = vector.multi_reduction <maximumf>, %27, %cst_15 [1] : vector<16x128xf32> to vector<16xf32>
      %30 = vector.shape_cast %29 : vector<16xf32> to vector<16x1xf32>
      %31 = vector.broadcast %30 : vector<16x1xf32> to vector<16x128xf32>
      %32 = arith.subf %27, %31 : vector<16x128xf32>
      %33 = math.exp %32 : vector<16x128xf32>
      %cst_16 = arith.constant dense<0.000000e+00> : vector<16xf32>
      %34 = vector.multi_reduction <add>, %33, %cst_16 [1] : vector<16x128xf32> to vector<16xf32>
      %35 = vector.shape_cast %34 : vector<16xf32> to vector<16x1xf32>
      %36 = math.log %35 : vector<16x1xf32>
      %37 = arith.addf %30, %36 : vector<16x1xf32>
      %38 = vector.broadcast %20 : vector<16x1xi32> to vector<16x128xi32>
      %39 = arith.cmpi eq, %28, %38 : vector<16x128xi32>
      %cst_17 = arith.constant -1.000000e+30 : f32
      %40 = vector.broadcast %cst_17 : f32 to vector<16x128xf32>
      %41 = arith.select %39, %27, %40 : vector<16x128xi1>, vector<16x128xf32>
      %cst_18 = arith.constant dense<0xFF800000> : vector<16xf32>
      %42 = vector.multi_reduction <maximumf>, %41, %cst_18 [1] : vector<16x128xf32> to vector<16xf32>
      %43 = vector.shape_cast %42 : vector<16xf32> to vector<16x1xf32>
      %44 = arith.subf %37, %43 : vector<16x1xf32>
      %45 = vector.broadcast %30 : vector<16x1xf32> to vector<16x128xf32>
      %46 = arith.cmpf oeq, %27, %45 : vector<16x128xf32>
      %c128_i32 = arith.constant 128 : i32
      %47 = vector.broadcast %c128_i32 : i32 to vector<16x128xi32>
      %48 = arith.select %46, %28, %47 : vector<16x128xi1>, vector<16x128xi32>
      %cst_19 = arith.constant dense<2147483647> : vector<16xi32>
      %49 = vector.multi_reduction <minsi>, %48, %cst_19 [1] : vector<16x128xi32> to vector<16xi32>
      %50 = vector.shape_cast %49 : vector<16xi32> to vector<16x1xi32>
      %51 = arith.cmpi eq, %50, %20 : vector<16x1xi32>
      %52 = arith.extui %51 : vector<16x1xi1> to vector<16x1xi32>
      %53 = arith.sitofp %52 : vector<16x1xi32> to vector<16x1xf32>
      %c0_20 = arith.constant 0 : index
      %c0_21 = arith.constant 0 : index
      %54 = vector.load %arg6[%c0_20, %c0_21] : memref<1x128xf32, #tpu.memory_space<vmem>>, vector<1x128xf32>
      %cst_22 = arith.constant 0.000000e+00 : f32
      %55 = vector.broadcast %cst_22 : f32 to vector<1x128xf32>
      %56 = arith.cmpf ogt, %54, %55 : vector<1x128xf32>
      %cst_23 = arith.constant 0.000000e+00 : f32
      %57 = vector.shape_cast %56 : vector<1x128xi1> to vector<1x128xi1>
      %58 = vector.broadcast %57 : vector<1x128xi1> to vector<16x128xi1>
      %59 = vector.broadcast %cst_23 : f32 to vector<16x128xf32>
      %60 = arith.select %58, %59, %27 : vector<16x128xi1>, vector<16x128xf32>
      %cst_24 = arith.constant dense<0xFF800000> : vector<16xf32>
      %61 = vector.multi_reduction <maximumf>, %60, %cst_24 [1] : vector<16x128xf32> to vector<16xf32>
      %62 = vector.shape_cast %61 : vector<16xf32> to vector<16x1xf32>
      %63 = tpu.iota {dimensions = array<i32: 1>} : vector<16x8xi32>
      %c0_i32_25 = arith.constant 0 : i32
      %64 = vector.broadcast %c0_i32_25 : i32 to vector<16x8xi32>
      %65 = arith.cmpi eq, %63, %64 : vector<16x8xi32>
      %cst_26 = arith.constant 0.000000e+00 : f32
      %66 = vector.shape_cast %44 : vector<16x1xf32> to vector<16x1xf32>
      %67 = vector.broadcast %66 : vector<16x1xf32> to vector<16x8xf32>
      %68 = vector.broadcast %cst_26 : f32 to vector<16x8xf32>
      %69 = arith.select %65, %67, %68 : vector<16x8xi1>, vector<16x8xf32>
      %c1_i32_27 = arith.constant 1 : i32
      %70 = vector.broadcast %c1_i32_27 : i32 to vector<16x8xi32>
      %71 = arith.cmpi eq, %63, %70 : vector<16x8xi32>
      %cst_28 = arith.constant 1.000000e+00 : f32
      %cst_29 = arith.constant 0.000000e+00 : f32
      %72 = vector.broadcast %cst_28 : f32 to vector<16x8xf32>
      %73 = vector.broadcast %cst_29 : f32 to vector<16x8xf32>
      %74 = arith.select %71, %72, %73 : vector<16x8xi1>, vector<16x8xf32>
      %75 = arith.addf %69, %74 : vector<16x8xf32>
      %c2_i32 = arith.constant 2 : i32
      %76 = vector.broadcast %c2_i32 : i32 to vector<16x8xi32>
      %77 = arith.cmpi eq, %63, %76 : vector<16x8xi32>
      %cst_30 = arith.constant 0.000000e+00 : f32
      %78 = vector.shape_cast %53 : vector<16x1xf32> to vector<16x1xf32>
      %79 = vector.broadcast %78 : vector<16x1xf32> to vector<16x8xf32>
      %80 = vector.broadcast %cst_30 : f32 to vector<16x8xf32>
      %81 = arith.select %77, %79, %80 : vector<16x8xi1>, vector<16x8xf32>
      %82 = arith.addf %75, %81 : vector<16x8xf32>
      %c3_i32 = arith.constant 3 : i32
      %83 = vector.broadcast %c3_i32 : i32 to vector<16x8xi32>
      %84 = arith.cmpi eq, %63, %83 : vector<16x8xi32>
      %85 = arith.sitofp %50 : vector<16x1xi32> to vector<16x1xf32>
      %cst_31 = arith.constant 0.000000e+00 : f32
      %86 = vector.shape_cast %85 : vector<16x1xf32> to vector<16x1xf32>
      %87 = vector.broadcast %86 : vector<16x1xf32> to vector<16x8xf32>
      %88 = vector.broadcast %cst_31 : f32 to vector<16x8xf32>
      %89 = arith.select %84, %87, %88 : vector<16x8xi1>, vector<16x8xf32>
      %90 = arith.addf %82, %89 : vector<16x8xf32>
      %c4_i32 = arith.constant 4 : i32
      %91 = vector.broadcast %c4_i32 : i32 to vector<16x8xi32>
      %92 = arith.cmpi eq, %63, %91 : vector<16x8xi32>
      %cst_32 = arith.constant 0.000000e+00 : f32
      %93 = vector.shape_cast %62 : vector<16x1xf32> to vector<16x1xf32>
      %94 = vector.broadcast %93 : vector<16x1xf32> to vector<16x8xf32>
      %95 = vector.broadcast %cst_32 : f32 to vector<16x8xf32>
      %96 = arith.select %92, %94, %95 : vector<16x8xi1>, vector<16x8xf32>
      %97 = arith.addf %90, %96 : vector<16x8xf32>
      %98 = vector.broadcast %21 : vector<16x1xf32> to vector<16x8xf32>
      %99 = arith.mulf %97, %98 : vector<16x8xf32>
      %c0_33 = arith.constant 0 : index
      %c0_34 = arith.constant 0 : index
      %100 = vector.load %arg5[%c0_33, %c0_34] : memref<1x8xf32, #tpu.memory_space<vmem>>, vector<1x8xf32>
      %cst_35 = arith.constant dense<0.000000e+00> : vector<8xf32>
      %101 = vector.multi_reduction <add>, %99, %cst_35 [0] : vector<16x8xf32> to vector<8xf32>
      %102 = vector.shape_cast %101 : vector<8xf32> to vector<1x8xf32>
      %103 = arith.addf %100, %102 : vector<1x8xf32>
      %c0_36 = arith.constant 0 : index
      %c0_37 = arith.constant 0 : index
      %104 = vector.load %arg5[%c0_36, %c0_37] : memref<1x8xf32, #tpu.memory_space<vmem>>, vector<1x8xf32>
      tpu.vector_store %arg5[%c0_36, %c0_37], %103 {strides = array<i32>} : memref<1x8xf32, #tpu.memory_space<vmem>>, vector<1x8xf32>,
    } else {
    }
    %c1_i32_5 = arith.constant 1 : i32
    %11 = arith.cmpi eq, %arg0, %c1_i32_5 : i32
    %c0_i32_6 = arith.constant 0 : i32
    %12 = arith.cmpi eq, %arg1, %c0_i32_6 : i32
    %13 = arith.andi %11, %12 : i1
    %14 = arith.extui %13 : i1 to i32
    %c0_i32_7 = arith.constant 0 : i32
    %15 = arith.cmpi ne, %14, %c0_i32_7 : i32
    scf.if %15 {
      %c0 = arith.constant 0 : index
      %c0_8 = arith.constant 0 : index
      %16 = vector.load %arg5[%c0, %c0_8] : memref<1x8xf32, #tpu.memory_space<vmem>>, vector<1x8xf32>
      %17 = tpu.iota {dimensions = array<i32: 1>} : vector<1x8xi32>
      %c1_i32_9 = arith.constant 1 : i32
      %18 = vector.broadcast %c1_i32_9 : i32 to vector<1x8xi32>
      %19 = arith.cmpi eq, %17, %18 : vector<1x8xi32>
      %cst = arith.constant 0.000000e+00 : f32
      %20 = vector.broadcast %cst : f32 to vector<1x8xf32>
      %21 = arith.select %19, %16, %20 : vector<1x8xi1>, vector<1x8xf32>
      %cst_10 = arith.constant dense<0xFF800000> : vector<1xf32>
      %22 = vector.multi_reduction <maximumf>, %21, %cst_10 [1] : vector<1x8xf32> to vector<1xf32>
      %23 = vector.shape_cast %22 : vector<1xf32> to vector<1x1xf32>
      %cst_11 = arith.constant 1.000000e+00 : f32
      %24 = vector.broadcast %cst_11 : f32 to vector<1x1xf32>
      %25 = arith.divf %24, %23 : vector<1x1xf32>
      %c0_i32_12 = arith.constant 0 : i32
      %26 = vector.broadcast %c0_i32_12 : i32 to vector<1x8xi32>
      %27 = arith.cmpi eq, %17, %26 : vector<1x8xi32>
      %c3_i32 = arith.constant 3 : i32
      %28 = vector.broadcast %c3_i32 : i32 to vector<1x8xi32>
      %29 = arith.cmpi eq, %17, %28 : vector<1x8xi32>
      %c4_i32 = arith.constant 4 : i32
      %30 = vector.broadcast %c4_i32 : i32 to vector<1x8xi32>
      %31 = arith.cmpi eq, %17, %30 : vector<1x8xi32>
      %32 = arith.ori %29, %31 : vector<1x8xi1>
      %33 = arith.ori %27, %32 : vector<1x8xi1>
      %34 = vector.broadcast %25 : vector<1x1xf32> to vector<1x8xf32>
      %35 = arith.mulf %16, %34 : vector<1x8xf32>
      %36 = arith.select %33, %35, %16 : vector<1x8xi1>, vector<1x8xf32>
      %c3_i32_13 = arith.constant 3 : i32
      %37 = vector.broadcast %c3_i32_13 : i32 to vector<1x8xi32>
      %38 = arith.cmpi eq, %17, %37 : vector<1x8xi32>
      %c4_i32_14 = arith.constant 4 : i32
      %39 = vector.broadcast %c4_i32_14 : i32 to vector<1x8xi32>
      %40 = arith.cmpi eq, %17, %39 : vector<1x8xi32>
      %41 = arith.ori %38, %40 : vector<1x8xi1>
      %cst_15 = arith.constant 0.000000e+00 : f32
      %42 = vector.broadcast %cst_15 : f32 to vector<1x1xf32>
      %43 = arith.cmpf ole, %23, %42 : vector<1x1xf32>
      %44 = vector.broadcast %43 : vector<1x1xi1> to vector<1x8xi1>
      %45 = arith.andi %44, %41 : vector<1x8xi1>
      %cst_16 = arith.constant 0.000000e+00 : f32
      %46 = vector.broadcast %cst_16 : f32 to vector<1x8xf32>
      %47 = arith.select %45, %46, %36 : vector<1x8xi1>, vector<1x8xf32>
      %c0_17 = arith.constant 0 : index
      %c0_18 = arith.constant 0 : index
      %48 = vector.load %arg5[%c0_17, %c0_18] : memref<1x8xf32, #tpu.memory_space<vmem>>, vector<1x8xf32>
      tpu.vector_store %arg5[%c0_17, %c0_18], %47 {strides = array<i32>} : memref<1x8xf32, #tpu.memory_space<vmem>>, vector<1x8xf32>,
    } else {
    }
    return
  }
  func.func @transform_0(%arg0: i32, %arg1: i32) -> (i32, i32) {
    %0 = arith.muli %arg0, %arg1 : i32
    %c0_i32 = arith.constant 0 : i32
    %c0_i32_0 = arith.constant 0 : i32
    return %0, %c0_i32 : i32, i32
  }
  func.func @transform_1(%arg0: i32, %arg1: i32) -> (i32, i32) {
    %c0_i32 = arith.constant 0 : i32
    %c0_i32_0 = arith.constant 0 : i32
    %c0_i32_1 = arith.constant 0 : i32
    return %c0_i32, %c0_i32_0 : i32, i32
  }
  func.func @transform_2(%arg0: i32, %arg1: i32) -> (i32, i32) {
    %c1_i32 = arith.constant 1 : i32
    %0 = arith.subi %c1_i32, %arg0 : i32
    %1 = arith.muli %0, %arg1 : i32
    %c0_i32 = arith.constant 0 : i32
    %c0_i32_0 = arith.constant 0 : i32
    return %1, %c0_i32 : i32, i32
  }
  func.func @transform_3(%arg0: i32, %arg1: i32) -> (i32, i32) {
    %c0_i32 = arith.constant 0 : i32
    %c0_i32_0 = arith.constant 0 : i32
    %c0_i32_1 = arith.constant 0 : i32
    return %c0_i32, %c0_i32_0 : i32, i32
  }
}

</mosaic_0001>

<bundles_post_ra>
// kernel: tpu_custom_call.1
= control target key start
LH: loop header
LB: loop body
LE: loop exit
PB: predicated region body
PF: predicated region fallthrough
CT: control target
= control target key end

     0   :  { %8 = vsyncpa [#allocation6], 0  ;;  %s1253_s0 = inlined_call_operand.hbm [shape: bf16[16,128], index: 0, kind: input, shape index: {}]   ;;  %s1254_s1 = inlined_call_operand.hbm [shape: bf16[128,128], index: 1, kind: input, shape index: {}]   ;;  %s1255_s2 = inlined_call_operand.hbm [shape: f32[16,128], index: 2, kind: input, shape index: {}]   ;;  %s1256_s3 = inlined_call_operand.hbm [shape: f32[1,8], index: 3, kind: output, shape index: {}]  }
   0x1   :  { %10 = vsyncpa [#allocation6 + $0x1], 0 }
   0x2   :  { %11 = vsyncpa [#allocation9], 0 }
   0x3   :  { %12 = vsyncpa [#allocation7], 0  ;;  %s1107_s12 = smov 0   ;;  %s1109_s13 = smov 0  }
   0x4   :  { %s1111_s14 = smov 0  }
   0x5 LB: > { %p849_p0 = scmp.lt.s32.totalorder %s1071_s14, 2  ;;  %p850_p1 = scmp.eq.s32.totalorder %s1071_s14, 0  ;;  %s1071_s14 = sphi %s1111_s14, %s18_s14   ;;  %s1067_s13 = sphi %s1109_s13, %s1260_s13   ;;  %s1063_s12 = sphi %s1107_s12, %s1259_s12  }
   0x6   : > { %s162_s15 = sand.u32 1, %s1071_s14   ;;  %s173_s18 = sshll.u32 %s1253_s0, 4  ;;  %s174_s18 = int_to_ptr.hbm [resolvable:$true] %s173_s18 }
   0x7   : > { %p1128_p2 = pnand %p850_p1, %p849_p0  ;;  %s1073_s20 = smov [#allocation5]  }
   0x8   : > { %s175_s21 = sshll.u32 %s1073_s20, 4  ;;  %s1132_s22 = scalar_lea.sflag [#allocation6], %s162_s15  ;;  %s176_s21 = int_to_ptr.vmem [resolvable:$true] %s175_s21 }
   0x9   : > { %s1074_s23 = smov 64   ;;  %s1075_s24 = smov 4  }
   0xa   : > { %844 = dma.hbm_to_vmem [thread:$0]  (!%p1128_p2), %s174_s18, 128, %s176_s21, %s1132_s22, %s1074_s23, %s1074_s23, %s1075_s24  }
   0xb   : > { %s1138_s25 = sadd.s32 4294967295, %s1071_s14   ;;  %s30_s26 = sadd.s32 1, %s1067_s13 }
   0xc   : > { %p743_p3 = scmp.ge.s32.totalorder %s1071_s14, 1  ;;  %p32_p4 = scmp.ge.s32.totalorder %s30_s26, 2 }
   0xd   : > { %p135_p5 = scmp.lt.s32.totalorder %s1071_s14, 3  ;;  %p848_p6 = scmp.eq.s32.totalorder %s1138_s25, 0 }
   0xe   : > { %s1262_s26 = smov (%p32_p4, %s30_s26), 0  ;;  %s146_s30 = sshll.u32 %s1254_s1, 4  ;;  %s147_s30 = int_to_ptr.hbm [resolvable:$true] %s146_s30 }
   0xf   : > { %p1146_p7 = pnand %p743_p3, %p135_p5  ;;  %s1076_s4 = smov [#allocation8]  }
  0x10   : > { %s148_s5 = sshll.u32 %s1076_s4, 4  ;;  %s197_s8 = sshll.u32 %s1255_s2, 4  ;;  %s149_s5 = int_to_ptr.vmem [resolvable:$true] %s148_s5  ;;  %s198_s8 = int_to_ptr.hbm [resolvable:$true] %s197_s8 }
  0x11   : > { %p837_p8 = pneg %p1146_p7  ;;  %s1077_s9 = smov [#allocation10]  }
  0x12   : > { %s199_s10 = sshll.u32 %s1077_s9, 4  ;;  %s1078_s11 = smov 128   ;;  %s200_s10 = int_to_ptr.vmem [resolvable:$true] %s199_s10 }
  0x13   : > { %p838_p9 = pnand %p848_p6, %p837_p8  ;;  %s1079_s15 = smov 8  }
  0x14   : > { %847 = dma.hbm_to_vmem [thread:$0]  (!%p1128_p2), %s198_s8, 256, %s200_s10, %s1132_s22, %s1078_s11, %s1078_s11, %s1079_s15  }
  0x15   : > { %840 = dma.hbm_to_vmem [thread:$0]  (!%p838_p9), %s147_s30, 1024, %s149_s5, [#allocation9], %s1074_s23, %s1074_s23, %s1075_s24  }
  0x16   : > { %211 = sbr.rel (%p1146_p7) target bundleno = 1304 (0x518), region = 32  ;;  %s213_s16 = sand.u32 (!%p1146_p7), 1, %s1138_s25  }
  0x17   : > { %s214_s17 = scalar_lea.sflag (!%p1146_p7), [#allocation6], %s213_s16 }
  0x1b   : > { %1046 = dma.done.wait (%p848_p6), %s214_s17, 128  }
  0x1c   : > { %1048 = vsyncadd (%p848_p6), %s214_s17, 4294967168 }
  0x1d   : > { %1050 = dma.done.wait (%p848_p6), [#allocation9], 1024  }
  0x1e   : > { %1052 = vsyncadd (%p848_p6), [#allocation9], 4294966272 }
  0x1f   : > { %1054 = dma.done.wait (%p848_p6), %s214_s17, 256  }
  0x20   : > { %1056 = vsyncadd (%p848_p6), %s214_s17, 4294967040  ;;  %p261_p10 = scmp.eq.s32.totalorder %s1063_s12, 0 }
  0x21   : > { %vm268_vm0 = vcmask (%p261_p10), 57344   ;;  %v270_v0 = vlaneseq (%p261_p10)  ;;  %v1080_v1 = vmov (%p261_p10), 0.0   ;;  %v1081_v3 = vmov (%p261_p10), -1e+30  }
  0x22   : > { %266 = sbr.rel (!%p261_p10) target bundleno = 40 (0x28), region = 48  ;;  %267 = vst [vmem:[#allocation2] sm:$0x1] (%p261_p10), %v1080_v1 }
  0x23   : > { %269 = vst.msk [vmem:[#allocation11] sm:$0x1] (%p261_p10), %vm268_vm0, %v1080_v1  ;;  %v271_v2 = vand.u32 (%p261_p10), 127, %v270_v0 }
  0x25   : > { %vm272_vm1 = vcmp.lt.s32.totalorder (%p261_p10), %v271_v2, 24 }
  0x26   : > { %v273_v4 = vsel (%p261_p10), %vm272_vm1, 0.0, %v1081_v3 }
  0x27   : > { %274 = vst [vmem:[#allocation3] sm:$0x1] %v273_v4 }
  0x28 PF: > { %p753_p11 = scmp.ne.s32.totalorder %s1063_s12, 0 }
  0x2a   : > { %277 = sbr.rel (%p753_p11) target bundleno = 436 (0x1b4), region = 52 }
  0x2f   : > { %v278_v5 = vld [vmem:[#allocation10] sm:$0xff]  ;;  %v279_v6 = vld [vmem:[#allocation10 + $0x8] sm:$0xff]  ;;  %v280_v7 = vlaneseq  ;;  %vm349_vm8 = vcmask 15360   ;;  %v1082_v32 = vmov 0.0   ;;  %v332_v50 = vld [vmem:[#allocation2] sm:$0x1] }
  0x30   : > { %282 = vmin.xlane.f32.xlu0 %v278_v5 }
  0x31   : > { %v281_v8 = vand.u32 127, %v280_v7 }
  0x33   : > { %vm342_vm7 = vcmp.eq.s32.totalorder %v281_v8, 0 }
  0x38   : > { %284 = vmin.xlane.f32.xlu0 %v279_v6 }
  0xa3   : > { %v283_v9 = vpop.xlane.xlu0 %282 }
  0xa4   : > { %vm286_vm2 = vcmp.eq.f32.partialorder %v278_v5, %v283_v9  ;;  %vm318_vm6 = vcmp.le.f32.partialorder %v283_v9, 0.5 }
  0xa5   : > { %v288_v10 = vsel %vm286_vm2, %v281_v8, 128  ;;  %v754_v33 = vsel %vm318_vm6, 1.0, %v1082_v32 }
  0xa6   : > { %v291_v11 = vshra.s32 %v288_v10, 16  ;;  %v290_v17 = vand.u32 65535, %v288_v10 }
  0xa8   : > { %v293_v12 = vcvt.s32.f32 %v291_v11  ;;  %v292_v19 = vcvt.s32.f32 %v290_v17 }
  0xaa   : > { %294 = vmin.xlane.f32.xlu1 %v293_v12 }
  0xab   : > { %v285_v13 = vpop.xlane.xlu0 %284 }
  0xac   : > { %vm287_vm3 = vcmp.eq.f32.partialorder %v279_v6, %v285_v13  ;;  %vm319_vm11 = vcmp.le.f32.partialorder %v285_v13, 0.5 }
  0xad   : > { %v289_v14 = vsel %vm287_vm3, %v281_v8, 128  ;;  %v755_v40 = vsel %vm319_vm11, 1.0, %v1082_v32 }
  0xae   : > { %v305_v15 = vshra.s32 %v289_v14, 16  ;;  %v304_v21 = vand.u32 65535, %v289_v14 }
  0xb0   : > { %v307_v16 = vcvt.s32.f32 %v305_v15  ;;  %v306_v23 = vcvt.s32.f32 %v304_v21 }
  0xb2   : > { %308 = vmin.xlane.f32.xlu1 %v307_v16 }
 0x11d   : > { %v295_v18 = vpop.xlane.xlu1 %294 }
 0x11e   : > { %vm296_vm4 = vcmp.eq.f32.partialorder %v293_v12, %v295_v18  ;;  %v301_v25 = vcvt.f32.s32 %v295_v18 }
 0x11f   : > { %v297_v20 = vsel %vm296_vm4, %v292_v19, inf }
 0x120   : > { %298 = vmin.xlane.f32.xlu2 %v297_v20  ;;  %v302_v27 = vshll.u32 %v301_v25, 16 }
 0x125   : > { %v309_v22 = vpop.xlane.xlu1 %308 }
 0x126   : > { %vm310_vm5 = vcmp.eq.f32.partialorder %v307_v16, %v309_v22  ;;  %v315_v30 = vcvt.f32.s32 %v309_v22 }
 0x127   : > { %v311_v24 = vsel %vm310_vm5, %v306_v23, inf }
 0x128   : > { %312 = vmin.xlane.f32.xlu2 %v311_v24  ;;  %v316_v36 = vshll.u32 %v315_v30, 16 }
 0x193   : > { %v299_v26 = vpop.xlane.xlu2 %298 }
 0x194   : > { %v300_v28 = vcvt.f32.s32 %v299_v26 }
 0x196   : > { %v303_v29 = vadd.s32 %v302_v27, %v300_v28 }
 0x198   : > { %vm324_vm9 = vcmp.eq.s32.totalorder %v281_v8, %v303_v29  ;;  %v343_v31 = vcvt.s32.f32 %v303_v29 }
 0x199   : > { %vm328_vm10 = vmand %vm324_vm9, %vm318_vm6 }
 0x19a   : > { %v345_v34 = vsel %vm342_vm7, %v343_v31, %v754_v33  ;;  %v330_v41 = vsel %vm328_vm10, 1.0, %v1082_v32 }
 0x19b   : > { %350 = vst.msk [vmem:[#allocation4] sm:$0xff] %vm349_vm8, %v345_v34  ;;  %v313_v35 = vpop.xlane.xlu2 %312 }
 0x19c   : > { %v314_v37 = vcvt.f32.s32 %v313_v35 }
 0x19e   : > { %v317_v38 = vadd.s32 %v316_v36, %v314_v37 }
 0x1a0   : > { %vm325_vm12 = vcmp.eq.s32.totalorder %v281_v8, %v317_v38  ;;  %v344_v39 = vcvt.s32.f32 %v317_v38 }
 0x1a1   : > { %vm329_vm13 = vmand %vm325_vm12, %vm319_vm11 }
 0x1a2   : > { %v331_v42 = vsel %vm329_vm13, 1.0, %v1082_v32  ;;  %v346_v43 = vsel %vm342_vm7, %v344_v39, %v755_v40 }
 0x1a3   : > { %v333_v44 = vmax.f32 %v330_v41, %v331_v42  ;;  %351 = vst.msk [vmem:[#allocation4 + $0x8] sm:$0xff] %vm349_vm8, %v346_v43 }
 0x1a5   : > { %v334_v45 = vrot.slane %v333_v44, 4 }
 0x1a7   : > { %v335_v46 = vmax.f32 %v333_v44, %v334_v45 }
 0x1a9   : > { %v336_v47 = vrot.slane %v335_v46, 2 }
 0x1ab   : > { %v337_v48 = vmax.f32 %v335_v46, %v336_v47 }
 0x1ad   : > { %v338_v49 = vrot.slane %v337_v48, 1 }
 0x1af   : > { %v339_v51 = vmax.f32 %v337_v48, %v338_v49 }
 0x1b1   : > { %v340_v52 = vmax.f32 %v332_v50, %v339_v51 }
 0x1b3   : > { %341 = vst [vmem:[#allocation2] sm:$0x1] %v340_v52 }
 0x1b4 PF: > { %p352_p12 = scmp.eq.s32.totalorder %s1063_s12, 1  ;;  %p756_p13 = scmp.ne.s32.totalorder %s1063_s12, 1 }
 0x1b6   : > { %355 = sbr.rel (%p756_p13) target bundleno = 1151 (0x47f), region = 56 }
 0x1bb   : > { %v809_v53 = vld [vmem:[#allocation8 + $0x38] sm:$0xff]  ;;  %v808_v54 = vld [vmem:[#allocation8 + $0x30] sm:$0xff]  ;;  %v807_v55 = vld [vmem:[#allocation8 + $0x28] sm:$0xff]  ;;  %v1083_v60 = vmov 0   ;;  %v452_v14 = vlaneseq  ;;  %v1084_v48 = vmov 1  }
 0x1bc   : > { %438 = vmatpush.bf16.xpose.msra.mxu0 %v809_v53  ;;  %v806_v56 = vld [vmem:[#allocation8 + $0x20] sm:$0xff]  ;;  %v805_v57 = vld [vmem:[#allocation8 + $0x18] sm:$0xff]  ;;  %v1188_v59 = vld [vmem:[#allocation4 + $0x8] sm:$0xff]  ;;  %895 = vset.pattern.permute.xlu2 %v1083_v60 }
 0x1bd   : > { %v1186_v58 = vld [vmem:[#allocation4] sm:$0xff]  ;;  %896 = vset.pattern.permute.xlu1 %v1083_v60  ;;  %v817_v0 = vceil.f32 %v1188_v59  ;;  %v818_v1 = vfloor.f32 %v1188_v59  ;;  %vm816_vm15 = vcmp.lt.s32.totalorder %v1188_v59, 0  ;;  %v804_v3 = vld [vmem:[#allocation8 + $0x10] sm:$0xff]  ;;  %v803_v6 = vld [vmem:[#allocation8 + $0x8] sm:$0xff]  ;;  %v1208_v15 = vand.u32 127, %v452_v14  ;;  %902 = vset.pattern.permute.xlu0 %v1084_v48 }
 0x1be   : > { %vm811_vm14 = vcmp.lt.s32.totalorder %v1186_v58, 0  ;;  %v812_v61 = vceil.f32 %v1186_v58  ;;  %v813_v62 = vfloor.f32 %v1186_v58  ;;  %v802_v7 = vld [vmem:[#allocation8] sm:$0xff]  ;;  %v801_v8 = vld [vmem:[#allocation5] sm:$0xff]  ;;  %v904_v9 = vld [vmem:[#allocation3] ss:$0 sm:$0xff] }
 0x1bf   : > { %v1203_v4 = vsel %vm816_vm15, %v817_v0, %v818_v1  ;;  %v528_v35 = vld [vmem:[#allocation2] sm:$0x1]  ;;  %vm539_vm10 = vcmp.eq.s32.totalorder %v1208_v15, 0  ;;  %vm542_vm11 = vcmp.eq.s32.totalorder %v1208_v15, 1  ;;  %vm546_vm12 = vcmp.eq.s32.totalorder %v1208_v15, 2 }
 0x1c0   : > { %v1195_v63 = vsel %vm811_vm14, %v812_v61, %v813_v62  ;;  %v820_v5 = vcvt.f32.s32 %v1203_v4  ;;  %vm529_vm3 = vcmp.gt.f32.partialorder %v528_v35, 0.0  ;;  %v1085_v61 = vmov 0.0  }
 0x1c1   : > { %v815_v2 = vcvt.f32.s32 %v1195_v63  ;;  %v530_v40 = vsel %vm529_vm3, 1, %v1083_v60  ;;  %vm561_vm13 = vcmp.eq.s32.totalorder %v1208_v15, 3  ;;  %vm568_vm14 = vcmp.eq.s32.totalorder %v1208_v15, 4 }
 0x1c2   : > { %v531_v43 = vperm.slane %v530_v40, 0  ;;  %vm586_vm15 = vcmask 64512  }
 0x1c3   : > { %475 = vperm.xlu2 %895, %v815_v2  }
 0x1c4   : > { %439 = vmatpush.bf16.xpose.msra.mxu0 %v808_v54  ;;  %vm532_vm7 = vcmp.eq.s32.totalorder %v531_v43, 1 }
 0x1cb   : > { %478 = vperm.xlu2 %895, %v820_v5  }
 0x1cc   : > { %440 = vmatpush.bf16.xpose.msra.mxu0 %v807_v55 }
 0x1d4   : > { %441 = vmatpush.bf16.xpose.msra.mxu0 %v806_v56 }
 0x1dc   : > { %442 = vmatpush.bf16.xpose.msra.mxu0 %v805_v57 }
 0x1e4   : > { %443 = vmatpush.bf16.xpose.msra.mxu0 %v804_v3 }
 0x1ec   : > { %444 = vmatpush.bf16.xpose.msra.mxu0 %v803_v6 }
 0x1f4   : > { %445 = vmatpush.bf16.xpose.msra.mxu0 %v802_v7 }
 0x1fb   : > { %446 = vmatmul.bf16.vlgmr.msra.gmra.mxu0 %v801_v8 }
 0x21d   : > { %v476_v30 = vpop.permute.xlu2 %475 }
 0x21e   : > { %vm480_vm6 = vcmp.eq.s32.totalorder %v1208_v15, %v476_v30 }
 0x225   : > { %v479_v36 = vpop.permute.xlu2 %478 }
 0x226   : > { %vm481_vm4 = vcmp.eq.s32.totalorder %v1208_v15, %v479_v36 }
 0x278   : > { %v447_v10 = vpop.f32.mrf.mxu0 }
 0x279   : > { %v448_v11 = vadd.f32 %v904_v9, %v447_v10 }
 0x27b   : > { %454 = vmax.xlane.f32.xlu0 %v448_v11  ;;  %v482_v44 = vsel %vm480_vm6, %v448_v11, -1e+30  ;;  %v533_v45 = vsel %vm532_vm7, 0.0, %v448_v11 }
 0x280   : > { %v449_v12 = vpop.f32.mrf.mxu0 }
 0x281   : > { %v450_v13 = vadd.f32 %v904_v9, %v449_v12 }
 0x283   : > { %456 = vmax.xlane.f32.xlu0 %v450_v13  ;;  %v483_v42 = vsel %vm481_vm4, %v450_v13, -1e+30  ;;  %v534_v46 = vsel %vm532_vm7, 0.0, %v450_v13 }
 0x2ee   : > { %v1210_v16 = vpop.xlane.xlu0 %454 }
 0x2ef   : > { %v458_v17 = vsub.f32 %v448_v11, %v1210_v16  ;;  %vm490_vm0 = vcmp.eq.f32.partialorder %v448_v11, %v1210_v16 }
 0x2f0   : > { %v492_v18 = vsel %vm490_vm0, %v1208_v15, 128  ;;  %vm597_vm0 = vcmask 57344  }
 0x2f1   : > { %v460_v19 = vmul.f32 1.442695, %v458_v17  ;;  %v495_v20 = vshra.s32 %v492_v18, 16  ;;  %v494_v31 = vand.u32 65535, %v492_v18 }
 0x2f3   : > { %905 = vpow2.f32 %v460_v19  ;;  %v497_v21 = vcvt.s32.f32 %v495_v20  ;;  %v496_v33 = vcvt.s32.f32 %v494_v31 }
 0x2f5   : > { %498 = vmin.xlane.f32.xlu1 %v497_v21 }
 0x2f6   : > { %v1215_v22 = vpop.xlane.xlu0 %456 }
 0x2f7   : > { %v459_v23 = vsub.f32 %v450_v13, %v1215_v22  ;;  %vm491_vm1 = vcmp.eq.f32.partialorder %v450_v13, %v1215_v22 }
 0x2f8   : > { %v493_v24 = vsel %vm491_vm1, %v1208_v15, 128 }
 0x2f9   : > { %v906_v25 = vpop.eup %905  ;;  %v462_v26 = vmul.f32 1.442695, %v459_v23  ;;  %v509_v27 = vshra.s32 %v493_v24, 16  ;;  %v508_v37 = vand.u32 65535, %v493_v24 }
 0x2fa   : > { %464 = vadd.xlane.f32.xlu2 %v906_v25 }
 0x2fb   : > { %907 = vpow2.f32 %v462_v26  ;;  %v511_v28 = vcvt.s32.f32 %v509_v27  ;;  %v510_v39 = vcvt.s32.f32 %v508_v37 }
 0x2fd   : > { %512 = vmin.xlane.f32.xlu1 %v511_v28 }
 0x301   : > { %v908_v29 = vpop.eup %907 }
 0x302   : > { %466 = vadd.xlane.f32.xlu0 %v908_v29 }
 0x368   : > { %v499_v32 = vpop.xlane.xlu1 %498 }
 0x369   : > { %vm500_vm2 = vcmp.eq.f32.partialorder %v497_v21, %v499_v32  ;;  %v505_v50 = vcvt.f32.s32 %v499_v32 }
 0x36a   : > { %v501_v34 = vsel %vm500_vm2, %v496_v33, inf }
 0x36b   : > { %502 = vmin.xlane.f32.xlu0 %v501_v34  ;;  %v506_v52 = vshll.u32 %v505_v50, 16 }
 0x36d   : > { %v465_v1 = vpop.xlane.xlu2 %464 }
 0x36e   : > { %909 = vlog2.f32 %v465_v1 }
 0x370   : > { %v513_v38 = vpop.xlane.xlu1 %512 }
 0x371   : > { %vm514_vm5 = vcmp.eq.f32.partialorder %v511_v28, %v513_v38  ;;  %v519_v53 = vcvt.f32.s32 %v513_v38 }
 0x372   : > { %v515_v41 = vsel %vm514_vm5, %v510_v39, inf }
 0x373   : > { %516 = vmin.xlane.f32.xlu1 %v515_v41  ;;  %486 = vmax.xlane.f32.xlu0 %v483_v42  ;;  %v520_v56 = vshll.u32 %v519_v53, 16 }
 0x374   : > { %v910_v6 = vpop.eup %909 }
 0x375   : > { %v467_v47 = vpop.xlane.xlu0 %466  ;;  %v469_v63 = vmul.f32 0.6931472, %v910_v6 }
 0x376   : > { %911 = vlog2.f32 %v467_v47 }
 0x37b   : > { %484 = vmax.xlane.f32.xlu1 %v482_v44  ;;  %535 = vmax.xlane.f32.xlu0 %v533_v45 }
 0x37c   : > { %v912_v7 = vpop.eup %911 }
 0x383   : > { %537 = vmax.xlane.f32.xlu0 %v534_v46  ;;  %v585_v46 = vld [vmem:[#allocation11] sm:$0x1] }
 0x397   : > { %575 = vperm.xlu0 %902, %v1186_v58  }
 0x3de   : > { %v503_v49 = vpop.xlane.xlu0 %502 }
 0x3df   : > { %v504_v51 = vcvt.f32.s32 %v503_v49 }
 0x3e1   : > { %v507_v54 = vadd.s32 %v506_v52, %v504_v51 }
 0x3e3   : > { %vm522_vm8 = vcmp.eq.s32.totalorder %v507_v54, %v815_v2  ;;  %v471_v2 = vmul.f32 0.6931472, %v912_v7  ;;  %v562_v18 = vcvt.s32.f32 %v507_v54 }
 0x3e4   : > { %v793_v62 = vsel %vm522_vm8, 1.0, %v1085_v61 }
 0x3e5   : > { %v473_v4 = vadd.f32 %v471_v2, %v1215_v22  ;;  %v564_v27 = vsel %vm561_vm13, %v562_v18, 0.0 }
 0x3e6   : > { %v517_v55 = vpop.xlane.xlu1 %516  ;;  %v487_v3 = vpop.xlane.xlu0 %486 }
 0x3e7   : > { %v518_v57 = vcvt.f32.s32 %v517_v55  ;;  %v489_v10 = vsub.f32 %v473_v4, %v487_v3 }
 0x3e9   : > { %v521_v60 = vadd.s32 %v520_v56, %v518_v57  ;;  %v541_v12 = vsel %vm539_vm10, %v489_v10, 0.0 }
 0x3eb   : > { %vm523_vm9 = vcmp.eq.s32.totalorder %v521_v60, %v820_v5  ;;  %v472_v5 = vadd.f32 %v469_v63, %v1210_v16  ;;  %v563_v19 = vcvt.s32.f32 %v521_v60 }
 0x3ec   : > { %v794_v0 = vsel %vm523_vm9, 1.0, %v1085_v61 }
 0x3ed   : > { %v897_v58 = vpack.i.bf16 %v794_v0, %v793_v62  ;;  %v565_v28 = vsel %vm561_vm13, %v563_v19, 0.0 }
 0x3ee   : > { %v536_v8 = vpop.xlane.xlu0 %535  ;;  %v485_v9 = vpop.xlane.xlu1 %484 }
 0x3ef   : > { %898 = vperm.xlu1 %896, %v897_v58   ;;  %v488_v11 = vsub.f32 %v472_v5, %v485_v9  ;;  %v569_v31 = vsel %vm568_vm14, %v536_v8, 0.0 }
 0x3f1   : > { %v540_v13 = vsel %vm539_vm10, %v488_v11, 0.0 }
 0x3f6   : > { %v538_v14 = vpop.xlane.xlu0 %537 }
 0x3f7   : > { %903 = vset.pattern.permute.xlu1 %v1084_v48  ;;  %v570_v32 = vsel %vm568_vm14, %v538_v14, 0.0 }
 0x3f8   : > { %580 = vperm.xlu1 %903, %v1188_v59   ;;  %v543_v59 = vsel %vm542_vm11, 1.0, %v1085_v61 }
 0x3f9   : > { %v545_v22 = vadd.f32 %v543_v59, %v541_v12  ;;  %v544_v23 = vadd.f32 %v543_v59, %v540_v13 }
 0x409   : > { %v576_v33 = vpop.permute.xlu0 %575 }
 0x461   : > { %v899_v17 = vpop.permute.xlu1 %898 }
 0x462   : > { %v901_v20 = vunpack.i.h.bf16 %v899_v17  ;;  %v900_v21 = vunpack.i.l.bf16 %v899_v17 }
 0x464   : > { %v558_v16 = vsel %vm546_vm12, %v901_v20, 0.0  ;;  %v557_v24 = vsel %vm546_vm12, %v900_v21, 0.0 }
 0x465   : > { %v560_v25 = vadd.f32 %v558_v16, %v545_v22  ;;  %v559_v26 = vadd.f32 %v557_v24, %v544_v23 }
 0x467   : > { %v566_v29 = vadd.f32 %v564_v27, %v559_v26  ;;  %v567_v30 = vadd.f32 %v565_v28, %v560_v25 }
 0x469   : > { %v571_v34 = vadd.f32 %v569_v31, %v566_v29  ;;  %v572_v35 = vadd.f32 %v570_v32, %v567_v30 }
 0x46a   : > { %v581_v36 = vpop.permute.xlu1 %580 }
 0x46b   : > { %v583_v37 = vmul.f32 %v576_v33, %v571_v34  ;;  %v584_v38 = vmul.f32 %v581_v36, %v572_v35 }
 0x46d   : > { %v587_v39 = vsel %vm586_vm15, %v583_v37, 0.0  ;;  %v588_v40 = vsel %vm586_vm15, %v584_v38, 0.0 }
 0x46e   : > { %v589_v41 = vadd.f32 %v588_v40, %v587_v39 }
 0x470   : > { %v590_v42 = vrot.slane %v589_v41, 4 }
 0x472   : > { %v591_v15 = vadd.f32 %v590_v42, %v589_v41 }
 0x474   : > { %v592_v43 = vrot.slane %v591_v15, 2 }
 0x476   : > { %v593_v44 = vadd.f32 %v592_v43, %v591_v15 }
 0x478   : > { %v594_v45 = vrot.slane %v593_v44, 1 }
 0x47a   : > { %v595_v47 = vadd.f32 %v594_v45, %v593_v44 }
 0x47c   : > { %v596_v48 = vadd.f32 %v595_v47, %v585_v46 }
 0x47e   : > { %598 = vst.msk [vmem:[#allocation11] sm:$0x1] %vm597_vm0, %v596_v48 }
 0x47f PF: > { %602 = sbr.rel (!%p352_p12) target bundleno = 1298 (0x512), region = 60  ;;  %v604_v49 = vlaneseq (%p352_p12)  ;;  %vm608_vm1 = vcmask (%p352_p12), 57344  }
 0x481   : > { %v605_v51 = vand.u32 (%p352_p12), 127, %v604_v49 }
 0x483   : > { %vm606_vm2 = vcmp.eq.s32.totalorder (%p352_p12), %v605_v51, 1  ;;  %vm628_vm4 = vcmp.eq.s32.totalorder (%p352_p12), %v605_v51, 3  ;;  %vm629_vm5 = vcmp.eq.s32.totalorder (%p352_p12), %v605_v51, 4  ;;  %vm627_vm7 = vcmp.eq.s32.totalorder (%p352_p12), %v605_v51, 0 }
 0x484   : > { %vm630_vm10 = vmor %vm628_vm4, %vm629_vm5 }
 0x485   : > { %v603_v50 = vld [vmem:[#allocation11] sm:$0x1]  ;;  %vm631_vm11 = vmor %vm627_vm7, %vm630_vm10 }
 0x486   : > { %v607_v52 = vsel %vm606_vm2, %v603_v50, 0.0 }
 0x487   : > { %v609_v53 = vsel %vm608_vm1, %v607_v52, -inf }
 0x488   : > { %610 = vmax.xlane.f32.xlu0 %v609_v53 }
 0x4fb   : > { %v611_v54 = vpop.xlane.xlu0 %610 }
 0x4fc   : > { %913 = vrcp.f32 %v611_v54  ;;  %v623_v60 = vand.u32 2147483648, %v611_v54  ;;  %v621_v62 = vand.u32 2147483647, %v611_v54  ;;  %vm617_vm6 = vweird.f32 %v611_v54 }
 0x4fd   : > { %vm634_vm12 = vcmp.le.f32.partialorder %v611_v54, 0.0 }
 0x4fe   : > { %v624_v58 = vor.u32 1.1754944e-38, %v623_v60  ;;  %vm622_vm9 = vcmp.eq.f32.partialorder %v621_v62, 8.507059e+37  ;;  %vm637_vm13 = vmand %vm634_vm12, %vm630_vm10 }
 0x502   : > { %v914_v55 = vpop.eup %913 }
 0x503   : > { %v613_v56 = vmul.f32 %v914_v55, %v611_v54  ;;  %vm618_vm3 = vweird.f32 %v914_v55 }
 0x504   : > { %vm619_vm8 = vmor %vm617_vm6, %vm618_vm3 }
 0x505   : > { %v614_v57 = vsub.f32 1.0, %v613_v56 }
 0x507   : > { %v615_v61 = vmul.f32 %v914_v55, %v614_v57 }
 0x509   : > { %v616_v0 = vadd.f32 %v914_v55, %v615_v61 }
 0x50b   : > { %v620_v1 = vsel %vm619_vm8, %v914_v55, %v616_v0 }
 0x50c   : > { %v625_v3 = vsel %vm622_vm9, %v624_v58, %v620_v1 }
 0x50d   : > { %v632_v6 = vmul.f32 %v625_v3, %v603_v50 }
 0x50f   : > { %v633_v7 = vsel %vm631_vm11, %v632_v6, %v603_v50 }
 0x510   : > { %v638_v63 = vsel %vm637_vm13, 0.0, %v633_v7 }
 0x511   : > { %639 = vst.msk [vmem:[#allocation11] sm:$0x1] %vm608_vm1, %v638_v63 }
 0x512 PF: > { %p855_p0 = scmp.eq.s32.totalorder %s1138_s25, 1  ;;  %s648_s19 = sshll.u32 %s1256_s3, 4  ;;  %s649_s19 = int_to_ptr.hbm [resolvable:$true] %s648_s19 }
 0x513   : > { %s1086_s20 = smov [#allocation11]  }
 0x514   : > { %s646_s21 = sshll.u32 %s1086_s20, 4  ;;  %s647_s21 = int_to_ptr.vmem [resolvable:$true] %s646_s21 }
 0x515   : > { %834 = dma.vmem_to_hbm [thread:$0]  (%p855_p0), %s647_s21, 16, %s649_s19, [#allocation7]  }
 0x516   : > { %1058 = dma.done.wait (%p855_p0), [#allocation7], 16  }
 0x517   : > { %1060 = vsyncadd (%p855_p0), [#allocation7], 4294967280 }
 0x518 PF: > { %s18_s14 = sadd.s32 1, %s1071_s14   ;;  %s1259_s12 = smov %s1067_s13 }
 0x519   : > { %p15_p1 = scmp.ge.s32.totalorder %s18_s14, 4   ;;  %s1260_s13 = smov %s1262_s26 }
 0x51b   :  { %17 = sbr.rel (!%p15_p1) target bundleno = 5 (0x5), region = 102 }
 0x520   :  { %662 = vsyncpa [#allocation6], 1 }
 0x521   :  { %664 = vsyncpa [#allocation6 + $0x1], 1 }
 0x522   :  { %665 = vsyncpa [#allocation9], 1 }
 0x523   :  { %666 = vsyncpa [#allocation7], 1 }
 0x524   :  { %668 = vsyncpa [#allocation7 + $0x1], 1 }

</bundles_post_ra>
